<compile_context>
chip_gen: v6e
topology: v6e:2x2x1
jax: 0.10.0
libtpu: 0.0.40
codegen_flags: <defaults>
</compile_context>

<pallas_src>
import numpy as np
import jax
import jax.numpy as jnp
from jax.experimental import pallas as pl
from jax.experimental.pallas import tpu as pltpu

# ----------------------------------------------------------------------------
# Synthetic, deterministic "config" (mirrors DbMelFeatureExtractionConfig).
# Chosen small so the example shapes stay tiny.
# ----------------------------------------------------------------------------
SAMPLE_RATE = 1600
WIN_SIZE = 0.01          # -> n_fft = 16 samples
HOP_SIZE = 0.005         # -> hop   = 8 samples
NUM_FILTERS = 8
F_MIN = 0.0
F_MAX = 800.0
MIN_AMP = 1e-10
CENTER = True
NORM = (1.0, 2.0)        # (mean, std_dev); None disables normalization

N_FFT = int(WIN_SIZE * SAMPLE_RATE)
HOP = int(HOP_SIZE * SAMPLE_RATE)
N_FREQ = N_FFT // 2 + 1

# Packed spectrum height: cos rows [0:N_FREQ), sin rows [N_FREQ:2*N_FREQ),
# rounded up to a full f32 sublane tile (8).  One matmul produces re|im.
PAD_SPEC = max(8, ((2 * N_FREQ + 7) // 8) * 8)
# Mel output rows padded to a sublane multiple (== NUM_FILTERS == 8 here).
PAD_MEL = max(8, ((NUM_FILTERS + 7) // 8) * 8)

# Fused dB + normalization constants:
#   (20*log10(x) - mean)/std  ==  log(x) * (20/ln10/std) + (-mean/std)
_LOG10 = np.log(10.0)
if NORM is not None:
    DB_SCALE = float(20.0 / _LOG10 / NORM[1])
    DB_SHIFT = float(-NORM[0] / NORM[1])
else:
    DB_SCALE = float(20.0 / _LOG10)
    DB_SHIFT = 0.0


# ----------------------------------------------------------------------------
# librosa.filters.mel (Slaney scale, slaney norm) re-implemented in numpy so
# the "mel_basis" buffer is built deterministically in-script.
# ----------------------------------------------------------------------------
def _hz_to_mel(freqs):
    freqs = np.asarray(freqs, dtype=np.float64)
    f_sp = 200.0 / 3.0
    mels = freqs / f_sp
    min_log_hz = 1000.0
    min_log_mel = min_log_hz / f_sp
    logstep = np.log(6.4) / 27.0
    return np.where(
        freqs >= min_log_hz,
        min_log_mel + np.log(np.maximum(freqs, 1e-10) / min_log_hz) / logstep,
        mels,
    )


def _mel_to_hz(mels):
    mels = np.asarray(mels, dtype=np.float64)
    f_sp = 200.0 / 3.0
    freqs = f_sp * mels
    min_log_hz = 1000.0
    min_log_mel = min_log_hz / f_sp
    logstep = np.log(6.4) / 27.0
    return np.where(
        mels >= min_log_mel,
        min_log_hz * np.exp(logstep * (mels - min_log_mel)),
        freqs,
    )


def mel_filterbank(sr, n_fft, n_mels, fmin, fmax):
    fftfreqs = np.linspace(0.0, sr / 2.0, n_fft // 2 + 1)
    mel_f = _mel_to_hz(np.linspace(_hz_to_mel(fmin), _hz_to_mel(fmax), n_mels + 2))
    fdiff = np.diff(mel_f)
    ramps = mel_f[:, None] - fftfreqs[None, :]
    lower = -ramps[:-2] / fdiff[:-1, None]
    upper = ramps[2:] / fdiff[1:, None]
    weights = np.maximum(0.0, np.minimum(lower, upper))
    enorm = 2.0 / (mel_f[2:n_mels + 2] - mel_f[:n_mels])     # slaney norm
    weights = weights * enorm[:, None]
    return weights.astype(np.float64)                        # [n_mels, n_freq]


# ----------------------------------------------------------------------------
# Constant matrices built offline (deterministic):
#   * Hann window folded into the DFT rows.
#   * cos and sin stacked into ONE [PAD_SPEC, n_fft] LHS -> single MXU pass,
#     no re/im slicing and no re*re + im*im add in the kernel.
#   * mel basis duplicated over the cos-rows and sin-rows of the spectrum so
#     the second matmul sums re^2 + im^2 implicitly (zero rows mask the pad).
# ----------------------------------------------------------------------------
def _build_constants():
    n = np.arange(N_FFT)
    window = 0.5 - 0.5 * np.cos(2.0 * np.pi * n / N_FFT)     # periodic Hann
    k = np.arange(N_FREQ)
    ang = 2.0 * np.pi * np.outer(k, n) / N_FFT               # [N_FREQ, N_FFT]
    cos_m = np.cos(ang) * window[None, :]                    # window folded in
    sin_m = np.sin(ang) * window[None, :]

    assert 2 * N_FREQ <= PAD_SPEC
    dft_t = np.zeros((PAD_SPEC, N_FFT), dtype=np.float32)    # packed re|im LHS
    dft_t[:N_FREQ, :] = cos_m
    dft_t[N_FREQ:2 * N_FREQ, :] = sin_m

    mel = mel_filterbank(SAMPLE_RATE, N_FFT, NUM_FILTERS, F_MIN, F_MAX)  # [m, n_freq]
    mel_dup = np.zeros((PAD_MEL, PAD_SPEC), dtype=np.float32)
    mel_dup[:NUM_FILTERS, :N_FREQ] = mel                     # weights the cos^2 rows
    mel_dup[:NUM_FILTERS, N_FREQ:2 * N_FREQ] = mel           # weights the sin^2 rows
    return dft_t, mel_dup


# ----------------------------------------------------------------------------
# Pallas kernel: one packed DFT matmul, elementwise square, mel projection,
# fused dB + normalization.  Frame axis lives on lanes -> both matmul outputs
# and the HBM writeback are lane-dense with zero padding waste.
# ----------------------------------------------------------------------------
def dbmel_kernel(frames_ref, dft_ref, mel_ref, out_ref):
    # frames_ref: [n_fft, TF]          frame axis on lanes (window folded into dft_ref)
    # dft_ref   : [PAD_SPEC, n_fft]    rows 0..n_freq = win*cos, n_freq..2n_freq = win*sin
    # mel_ref   : [PAD_MEL, PAD_SPEC]  mel basis duplicated over cos/sin rows
    # out_ref   : [PAD_MEL, TF]        lane-dense output tile (all 8 sublanes real)
    y = jnp.dot(dft_ref[...], frames_ref[...],
                preferred_element_type=jnp.float32,
                precision=jax.lax.Precision.HIGHEST)          # [PAD_SPEC, TF] = re|im
    power = y * y                                             # re^2 / im^2 per row
    mel = jnp.dot(mel_ref[...], power,
                  preferred_element_type=jnp.float32,
                  precision=jax.lax.Precision.HIGHEST)        # [PAD_MEL, TF]
    # (20*log10(max(min_amp, mel)) - mean)/std fused into one mul-add.
    out_ref[...] = jnp.log(jnp.maximum(MIN_AMP, mel)) * DB_SCALE + DB_SHIFT


def _pick_frame_tile(rows: int) -> int:
    """Lane-axis tile over B*n_frames: a multiple of 128, ~2048 lanes for long
    audio, and >=2 grid steps whenever there is enough work so v7x's two
    TensorCores both get a share via dimension_semantics=("parallel",)."""
    rows128 = ((rows + 127) // 128) * 128
    if rows128 <= 128:
        return 128
    n_tiles = max(2, (rows128 + 2047) // 2048)
    per_tile = (rows128 + n_tiles - 1) // n_tiles
    return min(2048, ((per_tile + 127) // 128) * 128)


def db_mel_feature_extraction(raw_audio, length):
    """raw_audio: [B, T] float32, length: [B] int32 -> ([B, T_frames, F], [B] int32)"""
    B, T = raw_audio.shape

    # --- framing (glue, plain JAX): torch.stft(center=True, pad_mode='constant') ---
    if CENTER:
        padded = jnp.pad(raw_audio, ((0, 0), (N_FFT // 2, N_FFT // 2)))
        n_frames = 1 + T // HOP
    else:
        padded = raw_audio
        n_frames = 1 + (T - N_FFT) // HOP
    Tp = padded.shape[1]
    rows = B * n_frames

    # Gather the frames DIRECTLY into the transposed [n_fft, B*n_frames] slab
    # (frame axis on lanes) -- a single gather, no separate XLA transpose pass.
    b_idx = np.repeat(np.arange(B), n_frames)
    f_idx = np.tile(np.arange(n_frames), B)
    flat_start = b_idx * Tp + f_idx * HOP                        # [rows]
    flat_idx = flat_start[None, :] + np.arange(N_FFT)[:, None]   # [n_fft, rows]
    frames_t = padded.reshape(B * Tp)[flat_idx].astype(jnp.float32)
    # TODO(synk): for production-size audio, assemble frames in-kernel from the padded
    # audio (pl.ANY + pltpu.make_async_copy, using hop == n_fft/2 two-half-DFT trick) to
    # remove the ~2x HBM duplication of overlapping frames created by this gather.

    TF = _pick_frame_tile(rows)
    rows_pad = pl.cdiv(rows, TF) * TF
    if rows_pad != rows:
        frames_t = jnp.pad(frames_t, ((0, 0), (0, rows_pad - rows)))

    dft_t, mel_dup = _build_constants()

    out = pl.pallas_call(
        dbmel_kernel,
        out_shape=jax.ShapeDtypeStruct((PAD_MEL, rows_pad), jnp.float32),
        grid_spec=pltpu.PrefetchScalarGridSpec(
            num_scalar_prefetch=0,
            grid=(rows_pad // TF,),
            in_specs=[
                pl.BlockSpec((N_FFT, TF), lambda r: (0, r)),        # frames tile
                pl.BlockSpec((PAD_SPEC, N_FFT), lambda r: (0, 0)),  # packed DFT (tiny)
                pl.BlockSpec((PAD_MEL, PAD_SPEC), lambda r: (0, 0)),  # dup mel basis (tiny)
            ],
            out_specs=pl.BlockSpec((PAD_MEL, TF), lambda r: (0, r)),
        ),
        # vmem_limit_bytes intentionally omitted: footprint is a few MiB even at
        # TF=2048, well inside the default scoped limit on v5e/v6e/v7x.
        compiler_params=pltpu.CompilerParams(
            dimension_semantics=("parallel",),
        ),
    )(frames_t, jnp.asarray(dft_t), jnp.asarray(mel_dup))

    # Restore [B, T_frames, F]; only the 8 real mel sublanes are touched here.
    feats = out[:NUM_FILTERS, :rows].T.reshape(B, n_frames, NUM_FILTERS)

    # --- frame-length computation (trivial integer glue) ---
    if CENTER:
        out_len = length // HOP + 1
    else:
        out_len = (length - N_FFT) // HOP + 1
    return feats, out_len.astype(jnp.int32)


if __name__ == "__main__":
    key = jax.random.PRNGKey(0)
    B, T = 2, 128
    raw_audio = jax.random.normal(key, (B, T), dtype=jnp.float32)
    length = jnp.array([128, 96], dtype=jnp.int32)

    feats, frame_len = db_mel_feature_extraction(raw_audio, length)
    jax.block_until_ready((feats, frame_len))

    assert feats.shape == (B, 1 + T // HOP, NUM_FILTERS)
    assert frame_len.dtype == jnp.int32
    assert bool(jnp.all(jnp.isfinite(feats)))

    # Pure-NumPy reference (rFFT path) sanity check against the fused kernel.
    audio_np = np.asarray(raw_audio, dtype=np.float64)
    pad = N_FFT // 2
    padded_np = np.pad(audio_np, ((0, 0), (pad, pad)))
    n_frames = 1 + T // HOP
    idx = np.arange(n_frames)[:, None] * HOP + np.arange(N_FFT)[None, :]
    frames_np = padded_np[:, idx]                                 # [B, n_frames, n_fft]
    win = 0.5 - 0.5 * np.cos(2.0 * np.pi * np.arange(N_FFT) / N_FFT)
    spec = np.fft.rfft(frames_np * win, n=N_FFT, axis=-1)
    power = np.abs(spec) ** 2
    mel_np = power @ mel_filterbank(SAMPLE_RATE, N_FFT, NUM_FILTERS, F_MIN, F_MAX).T
    db = 20.0 * np.log10(np.maximum(MIN_AMP, mel_np))
    ref = (db - NORM[0]) / NORM[1] if NORM is not None else db
    assert bool(np.max(np.abs(np.asarray(feats, dtype=np.float64) - ref)) < 1e-2)

    print("KERNEL_OK")
</pallas_src>

<mosaic_0001>
module attributes {stable_mosaic.version = 11 : i64} {
  func.func @dbmel_kernel(%arg0: i32, %arg1: memref<16x128xf32, #tpu.memory_space<vmem>>, %arg2: memref<24x16xf32, #tpu.memory_space<vmem>>, %arg3: memref<8x24xf32, #tpu.memory_space<vmem>>, %arg4: memref<8x128xf32, #tpu.memory_space<vmem>>) attributes {dimension_semantics = [#tpu.dimension_semantics<parallel>], iteration_bounds = array<i64: 1>, scalar_prefetch = 0 : i64, scratch_operands = 0 : i64, tpu.core_type = #tpu.core_type<tc>, window_params = [{transform_indices = @transform_0, window_bounds = array<i64: 16, 128>}, {pipeline_mode = #tpu.pipeline_mode<synchronous>, transform_indices = @transform_1, window_bounds = array<i64: 24, 16>}, {pipeline_mode = #tpu.pipeline_mode<synchronous>, transform_indices = @transform_2, window_bounds = array<i64: 8, 24>}, {transform_indices = @transform_3, window_bounds = array<i64: 8, 128>}]} {
    %c0 = arith.constant 0 : index
    %c0_0 = arith.constant 0 : index
    %0 = vector.load %arg2[%c0, %c0_0] : memref<24x16xf32, #tpu.memory_space<vmem>>, vector<24x16xf32>
    %c0_1 = arith.constant 0 : index
    %c0_2 = arith.constant 0 : index
    %1 = vector.load %arg1[%c0_1, %c0_2] : memref<16x128xf32, #tpu.memory_space<vmem>>, vector<16x128xf32>
    %cst = arith.constant dense<0.000000e+00> : vector<24x128xf32>
    %2 = tpu.matmul %0, %1, %cst {dimension_numbers = #tpu.dot_dimension_numbers<[1], [0], [0], [1], [0, 0, 1, 1], [], []>, precision = #tpu.contract_precision<fp32>} : vector<24x16xf32>, vector<16x128xf32>, vector<24x128xf32> -> vector<24x128xf32>
    %3 = arith.mulf %2, %2 : vector<24x128xf32>
    %c0_3 = arith.constant 0 : index
    %c0_4 = arith.constant 0 : index
    %4 = vector.load %arg3[%c0_3, %c0_4] : memref<8x24xf32, #tpu.memory_space<vmem>>, vector<8x24xf32>
    %cst_5 = arith.constant dense<0.000000e+00> : vector<8x128xf32>
    %5 = tpu.matmul %4, %3, %cst_5 {dimension_numbers = #tpu.dot_dimension_numbers<[1], [0], [0], [1], [0, 0, 1, 1], [], []>, precision = #tpu.contract_precision<fp32>} : vector<8x24xf32>, vector<24x128xf32>, vector<8x128xf32> -> vector<8x128xf32>
    %cst_6 = arith.constant 1.000000e-10 : f32
    %6 = vector.broadcast %cst_6 : f32 to vector<8x128xf32>
    %7 = arith.maximumf %6, %5 : vector<8x128xf32>
    %8 = math.log %7 : vector<8x128xf32>
    %cst_7 = arith.constant 4.34294462 : f32
    %9 = vector.broadcast %cst_7 : f32 to vector<8x128xf32>
    %10 = arith.mulf %8, %9 : vector<8x128xf32>
    %cst_8 = arith.constant -5.000000e-01 : f32
    %11 = vector.broadcast %cst_8 : f32 to vector<8x128xf32>
    %12 = arith.addf %10, %11 : vector<8x128xf32>
    %c0_9 = arith.constant 0 : index
    %c0_10 = arith.constant 0 : index
    %13 = vector.load %arg4[%c0_9, %c0_10] : memref<8x128xf32, #tpu.memory_space<vmem>>, vector<8x128xf32>
    tpu.vector_store %arg4[%c0_9, %c0_10], %12 {strides = array<i32>} : memref<8x128xf32, #tpu.memory_space<vmem>>, vector<8x128xf32>,
    return
  }
  func.func @transform_0(%arg0: i32) -> (i32, i32) {
    %c0_i32 = arith.constant 0 : i32
    %c0_i32_0 = arith.constant 0 : i32
    return %c0_i32, %arg0 : i32, i32
  }
  func.func @transform_1(%arg0: i32) -> (i32, i32) {
    %c0_i32 = arith.constant 0 : i32
    %c0_i32_0 = arith.constant 0 : i32
    %c0_i32_1 = arith.constant 0 : i32
    return %c0_i32, %c0_i32_0 : i32, i32
  }
  func.func @transform_2(%arg0: i32) -> (i32, i32) {
    %c0_i32 = arith.constant 0 : i32
    %c0_i32_0 = arith.constant 0 : i32
    %c0_i32_1 = arith.constant 0 : i32
    return %c0_i32, %c0_i32_0 : i32, i32
  }
  func.func @transform_3(%arg0: i32) -> (i32, i32) {
    %c0_i32 = arith.constant 0 : i32
    %c0_i32_0 = arith.constant 0 : i32
    return %c0_i32, %arg0 : i32, i32
  }
}

</mosaic_0001>

<bundles_post_ra>
// kernel: tpu_custom_call.1
= control target key start
LH: loop header
LB: loop body
LE: loop exit
PB: predicated region body
PF: predicated region fallthrough
CT: control target
= control target key end

     0   :  { %vm20_vm0 = vcmask 130048   ;;  %v1288_v3 = vmov 0.0   ;;  %vm1289_vm1 = vmmov 0   ;;  %s1451_s0 = inlined_call_operand.vmem [shape: f32[16,128], index: 0, kind: input, shape index: {}]   ;;  %s1452_s1 = inlined_call_operand.vmem [shape: f32[24,16], index: 1, kind: input, shape index: {}]   ;;  %s1453_s2 = inlined_call_operand.vmem [shape: f32[8,24], index: 2, kind: input, shape index: {}]   ;;  %s1454_s3 = inlined_call_operand.hbm [shape: f32[8,128], index: 3, kind: output, shape index: {}]  }
   0x1   :  { %v19_v0 = vld [vmem:[%s1451_s0 + $0x8] sm:$0xff]  ;;  %v18_v1 = vld [vmem:[%s1451_s0] sm:$0xff]  ;;  %1129 = vmatprep.subr.mxu0 %v1288_v3  ;;  %1142 = vmatprep.subr.mxu1 %v1288_v3  ;;  %v17_v8 = vld [vmem:[%s1452_s1 + $0x10] sm:$0xff] }
   0x2   :  { %v15_v2 = vld [vmem:[%s1452_s1] sm:$0xff]  ;;  %v1321_v4 = vand.u32 4294901760, %v19_v0  ;;  %v1324_v5 = vand.u32 4294901760, %v18_v1  ;;  %v16_v7 = vld [vmem:[%s1452_s1 + $0x8] sm:$0xff]  ;;  %1133 = vmatprep.mubr.msk.f32.mxu0 %vm1289_vm1, %v1288_v3  ;;  %1146 = vmatprep.mubr.msk.f32.mxu1 %vm1289_vm1, %v1288_v3  ;;  %v28_v11 = vsel %vm20_vm0, %v17_v8, 0 }
   0x3   :  { %v22_v6 = vsel %vm20_vm0, %v15_v2, 0  ;;  %v25_v10 = vsel %vm20_vm0, %v16_v7, 0 }
   0x4   :  { %v1334_v9 = vand.u32 4294901760, %v22_v6 }
   0x5   :  { %8 = vsyncpa [#allocation3], 0  ;;  %1130 = vmatpush3.msra.mxu0 %v1321_v4  ;;  %v157_v12 = vsub.f32 %v19_v0, %v1321_v4  ;;  %v164_v13 = vsub.f32 %v18_v1, %v1324_v5  ;;  %v1341_v14 = vand.u32 4294901760, %v25_v10  ;;  %v1343_v15 = vand.u32 4294901760, %v28_v11  ;;  %v578_v57 = vld [vmem:[%s1453_s2] sm:$0xff]  ;;  %s1290_s2 = smov [#allocation2]  }
   0x6   :  { %1131 = vmatprep.subr.mxu0 %v1288_v3  ;;  %v98_v16 = vsub.f32 %v22_v6, %v1334_v9  ;;  %vm579_vm2 = vcmask 195584   ;;  %s1067_s22 = sshll.u32 %s1290_s2, 4  ;;  %s1068_s22 = int_to_ptr.vmem [resolvable:$true] %s1067_s22 }
   0x7   :  { %1132 = vmatpush3.msra.mxu0 %v1324_v5  ;;  %v158_v17 = vand.u32 4294901760, %v157_v12  ;;  %v165_v18 = vand.u32 4294901760, %v164_v13  ;;  %v108_v19 = vsub.f32 %v25_v10, %v1341_v14  ;;  %v118_v20 = vsub.f32 %v28_v11, %v1343_v15  ;;  %s1266_s23 = scalar_lea.vmem %s1068_s22, 128  ;;  %p1271_p1 = scmp.lt.s32.totalorder %s1068_s22, %s1068_s22 }
   0x8   :  { %v99_v21 = vand.u32 4294901760, %v98_v16  ;;  %1155 = vmatprep.subr.mxu0 %v1288_v3  ;;  %v581_v63 = vsel %vm579_vm2, %v578_v57, 0  ;;  %p1267_p0 = scmp.ne.s32.totalorder %s1068_s22, %s1266_s23  ;;  %p1272_p2 = scmp.lt.s32.totalorder %s1266_s23, %s1266_s23 }
   0x9   :  { %v159_v22 = vsub.f32 %v157_v12, %v158_v17  ;;  %v166_v23 = vsub.f32 %v164_v13, %v165_v18  ;;  %v109_v24 = vand.u32 4294901760, %v108_v19  ;;  %v119_v26 = vand.u32 4294901760, %v118_v20 }
   0xa   :  { %v100_v25 = vsub.f32 %v98_v16, %v99_v21  ;;  %v1413_v7 = vand.u32 4294901760, %v581_v63  ;;  %p1273_p3 = por %p1272_p2, %p1271_p1 }
   0xb   :  { %v160_v27 = vand.u32 4294901760, %v159_v22  ;;  %v167_v28 = vand.u32 4294901760, %v166_v23  ;;  %v110_v29 = vsub.f32 %v108_v19, %v109_v24  ;;  %v120_v32 = vsub.f32 %v118_v20, %v119_v26 }
   0xc   :  { %v101_v30 = vand.u32 4294901760, %v100_v25  ;;  %p1274_p4 = pnand %p1273_p3, %p1267_p0 }
   0xd   :  { %1143 = vmatpush3.msra.mxu1 %v160_v27  ;;  %v111_v31 = vand.u32 4294901760, %v110_v29  ;;  %v121_v33 = vand.u32 4294901760, %v120_v32 }
   0xe   :  { %1134 = vmatmul.mubr.f32.vlgmr.msra.gmra.mxu0 %v101_v30  ;;  %1144 = vmatprep.subr.mxu1 %v1288_v3 }
   0xf   :  { %1145 = vmatpush3.msra.mxu1 %v167_v28  ;;  %1136 = vmatprep.mubr.msk.f32.mxu0 %vm1289_vm1, %v1288_v3 }
  0x10   :  { %1147 = vmatmul.mubr.f32.vlgmr.msra.gmra.mxu1 %v1334_v9  ;;  %1156 = vmatpush3.msra.mxu0 %v157_v12 }
  0x11   :  { %1149 = vmatprep.mubr.msk.f32.mxu1 %vm1289_vm1, %v1288_v3  ;;  %1168 = vmatprep.subr.mxu1 %v1288_v3 }
  0x12   :  { %1137 = vmatmul.mubr.f32.gmra.mxu0 %v111_v31  ;;  %1169 = vmatpush3.msra.mxu1 %v1321_v4 }
  0x13   :  { %1139 = vmatprep.mubr.msk.f32.mxu0 %vm1289_vm1, %v1288_v3  ;;  %1157 = vmatprep.subr.mxu0 %v1288_v3 }
  0x14   :  { %1150 = vmatmul.mubr.f32.gmra.mxu1 %v1341_v14  ;;  %1158 = vmatpush3.msra.mxu0 %v164_v13 }
  0x15   :  { %1152 = vmatprep.mubr.msk.f32.mxu1 %vm1289_vm1, %v1288_v3  ;;  %1170 = vmatprep.subr.mxu1 %v1288_v3 }
  0x16   :  { %1140 = vmatmul.mubr.f32.gmra.mxu0 %v121_v33  ;;  %1171 = vmatpush3.msra.mxu1 %v1324_v5 }
  0x17   :  { %1159 = vmatprep.mubr.msk.f32.mxu0 %vm1289_vm1, %v1288_v3  ;;  %1181 = vmatprep.subr.mxu0 %v1288_v3 }
  0x18   :  { %1153 = vmatmul.mubr.f32.gmra.mxu1 %v1343_v15  ;;  %1194 = vmatprep.subr.mxu1 %v1288_v3 }
  0x19   :  { %1172 = vmatprep.mubr.msk.f32.mxu1 %vm1289_vm1, %v1288_v3 }
  0x1a   :  { %1160 = vmatmul.mubr.f32.vlgmr.msra.gmra.mxu0 %v98_v16  ;;  %v1416_v16 = vsub.f32 %v581_v63, %v1413_v7 }
  0x1b   :  { %1162 = vmatprep.mubr.msk.f32.mxu0 %vm1289_vm1, %v1288_v3  ;;  %1182 = vmatpush3.msra.mxu0 %v158_v17 }
  0x1c   :  { %1173 = vmatmul.mubr.f32.vlgmr.msra.gmra.mxu1 %v99_v21  ;;  %1183 = vmatprep.subr.mxu0 %v1288_v3 }
  0x1d   :  { %1175 = vmatprep.mubr.msk.f32.mxu1 %vm1289_vm1, %v1288_v3  ;;  %1195 = vmatpush3.msra.mxu1 %v1321_v4 }
  0x1e   :  { %1163 = vmatmul.mubr.f32.gmra.mxu0 %v108_v19  ;;  %1196 = vmatprep.subr.mxu1 %v1288_v3 }
  0x1f   :  { %1165 = vmatprep.mubr.msk.f32.mxu0 %vm1289_vm1, %v1288_v3  ;;  %1184 = vmatpush3.msra.mxu0 %v165_v18 }
  0x20   :  { %1176 = vmatmul.mubr.f32.gmra.mxu1 %v109_v24  ;;  %1207 = vmatprep.subr.mxu0 %v1288_v3 }
  0x21   :  { %1178 = vmatprep.mubr.msk.f32.mxu1 %vm1289_vm1, %v1288_v3  ;;  %1197 = vmatpush3.msra.mxu1 %v1324_v5 }
  0x22   :  { %1166 = vmatmul.mubr.f32.gmra.mxu0 %v118_v20  ;;  %1216 = vmatprep.subr.mxu1 %v1288_v3 }
  0x23   :  { %1185 = vmatprep.mubr.msk.f32.mxu0 %vm1289_vm1, %v1288_v3 }
  0x24   :  { %1179 = vmatmul.mubr.f32.gmra.mxu1 %v119_v26  ;;  %v653_v26 = vand.u32 4294901760, %v1416_v16 }
  0x25   :  { %1198 = vmatprep.mubr.msk.f32.mxu1 %vm1289_vm1, %v1288_v3 }
  0x26   :  { %1186 = vmatmul.mubr.f32.vlgmr.msra.gmra.mxu0 %v1334_v9  ;;  %v654_v33 = vsub.f32 %v1416_v16, %v653_v26 }
  0x27   :  { %1188 = vmatprep.mubr.msk.f32.mxu0 %vm1289_vm1, %v1288_v3 }
  0x28   :  { %1199 = vmatmul.mubr.f32.vlgmr.msra.gmra.mxu1 %v1334_v9 }
  0x29   :  { %1201 = vmatprep.mubr.msk.f32.mxu1 %vm1289_vm1, %v1288_v3 }
  0x2a   :  { %1189 = vmatmul.mubr.f32.gmra.mxu0 %v1341_v14 }
  0x2b   :  { %1191 = vmatprep.mubr.msk.f32.mxu0 %vm1289_vm1, %v1288_v3 }
  0x2c   :  { %1202 = vmatmul.mubr.f32.gmra.mxu1 %v1341_v14 }
  0x2d   :  { %1204 = vmatprep.mubr.msk.f32.mxu1 %vm1289_vm1, %v1288_v3 }
  0x2e   :  { %1192 = vmatmul.mubr.f32.gmra.mxu0 %v1343_v15 }
  0x2f   :  { %1213 = vmatprep.mubr.msk.f32.mxu0 %vm1289_vm1, %v1288_v3 }
  0x30   :  { %1205 = vmatmul.mubr.f32.gmra.mxu1 %v1343_v15 }
  0x31   :  { %1222 = vmatprep.mubr.msk.f32.mxu1 %vm1289_vm1, %v1288_v3 }
  0xce   :  { %v103_v34 = vpop.f32.mrf.mxu0 }
  0xd0   :  { %v1135_v35 = vpop.f32.mrf.mxu0  ;;  %v204_v36 = vpop.f32.mrf.mxu1 }
  0xd1   :  { %v205_v51 = vadd.f32 %v204_v36, %v103_v34 }
  0xd2   :  { %v113_v37 = vpop.f32.mrf.mxu0  ;;  %v1148_v38 = vpop.f32.mrf.mxu1 }
  0xd3   :  { %v655_v38 = vand.u32 4294901760, %v654_v33 }
  0xd4   :  { %v1138_v39 = vpop.f32.mrf.mxu0  ;;  %v210_v40 = vpop.f32.mrf.mxu1 }
  0xd5   :  { %v211_v58 = vadd.f32 %v210_v40, %v113_v37 }
  0xd6   :  { %v123_v41 = vpop.f32.mrf.mxu0  ;;  %v1151_v42 = vpop.f32.mrf.mxu1 }
  0xd8   :  { %v1141_v43 = vpop.f32.mrf.mxu0  ;;  %v216_v44 = vpop.f32.mrf.mxu1 }
  0xd9   :  { %v217_v2 = vadd.f32 %v216_v44, %v123_v41 }
  0xda   :  { %v1154_v45 = vpop.f32.mrf.mxu1  ;;  %v292_v46 = vpop.f32.mrf.mxu0 }
  0xdb   :  { %v293_v54 = vadd.f32 %v292_v46, %v205_v51 }
  0xdc   :  { %v1161_v47 = vpop.f32.mrf.mxu0  ;;  %v381_v48 = vpop.f32.mrf.mxu1 }
  0xdd   :  { %v382_v61 = vadd.f32 %v381_v48, %v293_v54 }
  0xde   :  { %v299_v49 = vpop.f32.mrf.mxu0  ;;  %v1174_v50 = vpop.f32.mrf.mxu1 }
  0xdf   :  { %v300_v62 = vadd.f32 %v299_v49, %v211_v58 }
  0xe0   :  { %v1164_v52 = vpop.f32.mrf.mxu0  ;;  %v389_v53 = vpop.f32.mrf.mxu1 }
  0xe1   :  { %v390_v8 = vadd.f32 %v389_v53, %v300_v62 }
  0xe2   :  { %v306_v55 = vpop.f32.mrf.mxu0  ;;  %v1177_v56 = vpop.f32.mrf.mxu1 }
  0xe3   :  { %v307_v9 = vadd.f32 %v306_v55, %v217_v2 }
  0xe4   :  { %v1167_v59 = vpop.f32.mrf.mxu0  ;;  %v397_v60 = vpop.f32.mrf.mxu1 }
  0xe5   :  { %v398_v17 = vadd.f32 %v397_v60, %v307_v9 }
  0xe6   :  { %v1180_v0 = vpop.f32.mrf.mxu1  ;;  %v474_v1 = vpop.f32.mrf.mxu0 }
  0xe7   :  { %v475_v4 = vadd.f32 %v474_v1, %v382_v61 }
  0xe8   :  { %v1187_v5 = vpop.f32.mrf.mxu0  ;;  %v559_v6 = vpop.f32.mrf.mxu1 }
  0xe9   :  { %v560_v10 = vadd.f32 %v559_v6, %v475_v4 }
  0xea   :  { %v480_v11 = vpop.f32.mrf.mxu0  ;;  %v1200_v12 = vpop.f32.mrf.mxu1 }
  0xeb   :  { %v481_v13 = vadd.f32 %v480_v11, %v390_v8  ;;  %v575_v18 = vmul.f32 %v560_v10, %v560_v10 }
  0xec   :  { %v1190_v14 = vpop.f32.mrf.mxu0  ;;  %v565_v15 = vpop.f32.mrf.mxu1 }
  0xed   :  { %v566_v19 = vadd.f32 %v565_v15, %v481_v13  ;;  %v616_v27 = vand.u32 4294901760, %v575_v18 }
  0xee   :  { %v486_v20 = vpop.f32.mrf.mxu0  ;;  %v1203_v21 = vpop.f32.mrf.mxu1 }
  0xef   :  { %v576_v22 = vmul.f32 %v566_v19, %v566_v19  ;;  %v487_v23 = vadd.f32 %v486_v20, %v398_v17  ;;  %v703_v34 = vsub.f32 %v575_v18, %v616_v27 }
  0xf0   :  { %v1193_v24 = vpop.f32.mrf.mxu0  ;;  %v571_v25 = vpop.f32.mrf.mxu1 }
  0xf1   :  { %v613_v28 = vand.u32 4294901760, %v576_v22  ;;  %v572_v29 = vadd.f32 %v571_v25, %v487_v23  ;;  %v704_v39 = vand.u32 4294901760, %v703_v34 }
  0xf2   :  { %v1206_v30 = vpop.f32.mrf.mxu1 }
  0xf3   :  { %v696_v31 = vsub.f32 %v576_v22, %v613_v28  ;;  %v577_v32 = vmul.f32 %v572_v29, %v572_v29  ;;  %v705_v43 = vsub.f32 %v703_v34, %v704_v39 }
  0xf5   :  { %v610_v35 = vand.u32 4294901760, %v577_v32  ;;  %v697_v36 = vand.u32 4294901760, %v696_v31  ;;  %v706_v46 = vand.u32 4294901760, %v705_v43 }
  0xf7   :  { %v689_v37 = vsub.f32 %v577_v32, %v610_v35  ;;  %1208 = vmatpush3.msra.mxu0 %v610_v35  ;;  %v698_v41 = vsub.f32 %v696_v31, %v697_v36 }
  0xf8   :  { %1209 = vmatprep.subr.mxu0 %v1288_v3 }
  0xf9   :  { %v690_v40 = vand.u32 4294901760, %v689_v37  ;;  %1210 = vmatpush3.msra.mxu0 %v613_v28  ;;  %v699_v45 = vand.u32 4294901760, %v698_v41 }
  0xfa   :  { %1211 = vmatprep.subr.mxu0 %v1288_v3 }
  0xfb   :  { %v691_v42 = vsub.f32 %v689_v37, %v690_v40  ;;  %1212 = vmatpush3.msra.mxu0 %v616_v27 }
  0xfc   :  { %1225 = vmatprep.subr.mxu0 %v1288_v3  ;;  %1214 = vmatmul.mubr.f32.vlgmr.msra.gmra.mxu0 %v655_v38 }
  0xfd   :  { %1226 = vmatpush3.msra.mxu0 %v689_v37  ;;  %v692_v44 = vand.u32 4294901760, %v691_v42  ;;  %1231 = vmatprep.mubr.msk.f32.mxu0 %vm1289_vm1, %v1288_v3 }
  0xfe   :  { %1227 = vmatprep.subr.mxu0 %v1288_v3 }
  0xff   :  { %1217 = vmatpush3.msra.mxu1 %v692_v44  ;;  %1228 = vmatpush3.msra.mxu0 %v696_v31 }
 0x100   :  { %1218 = vmatprep.subr.mxu1 %v1288_v3  ;;  %1229 = vmatprep.subr.mxu0 %v1288_v3 }
 0x101   :  { %1219 = vmatpush3.msra.mxu1 %v699_v45  ;;  %1230 = vmatpush3.msra.mxu0 %v703_v34 }
 0x102   :  { %1220 = vmatprep.subr.mxu1 %v1288_v3  ;;  %1243 = vmatprep.subr.mxu0 %v1288_v3 }
 0x103   :  { %1221 = vmatpush3.msra.mxu1 %v706_v46  ;;  %1232 = vmatmul.mubr.f32.vlgmr.msra.gmra.mxu0 %v1416_v16 }
 0x104   :  { %1244 = vmatpush3.msra.mxu0 %v690_v40  ;;  %1234 = vmatprep.subr.mxu1 %v1288_v3 }
 0x105   :  { %1245 = vmatprep.subr.mxu0 %v1288_v3  ;;  %1223 = vmatmul.mubr.f32.vlgmr.msra.gmra.mxu1 %v1413_v7 }
 0x106   :  { %1235 = vmatpush3.msra.mxu1 %v610_v35  ;;  %1246 = vmatpush3.msra.mxu0 %v697_v36 }
 0x107   :  { %1236 = vmatprep.subr.mxu1 %v1288_v3  ;;  %1247 = vmatprep.subr.mxu0 %v1288_v3 }
 0x108   :  { %1237 = vmatpush3.msra.mxu1 %v613_v28  ;;  %1248 = vmatpush3.msra.mxu0 %v704_v39 }
 0x109   :  { %1238 = vmatprep.subr.mxu1 %v1288_v3  ;;  %1240 = vmatprep.mubr.msk.f32.mxu1 %vm1289_vm1, %v1288_v3 }
 0x10a   :  { %1239 = vmatpush3.msra.mxu1 %v616_v27  ;;  %1249 = vmatprep.mubr.msk.f32.mxu0 %vm1289_vm1, %v1288_v3 }
 0x10b   :  { %1252 = vmatprep.subr.mxu1 %v1288_v3  ;;  %1241 = vmatmul.mubr.f32.vlgmr.msra.gmra.mxu1 %v653_v26 }
 0x10c   :  { %1253 = vmatpush3.msra.mxu1 %v610_v35  ;;  %1250 = vmatmul.mubr.f32.vlgmr.msra.gmra.mxu0 %v1413_v7 }
 0x10d   :  { %1254 = vmatprep.subr.mxu1 %v1288_v3  ;;  %1258 = vmatprep.mubr.msk.f32.mxu1 %vm1289_vm1, %v1288_v3 }
 0x10e   :  { %1255 = vmatpush3.msra.mxu1 %v613_v28 }
 0x10f   :  { %1256 = vmatprep.subr.mxu1 %v1288_v3 }
 0x110   :  { %1257 = vmatpush3.msra.mxu1 %v616_v27 }
 0x111   :  { %1259 = vmatmul.mubr.f32.vlgmr.msra.gmra.mxu1 %v1413_v7 }
 0x1bc   :  { %v657_v47 = vpop.f32.mrf.mxu0 }
 0x1be   :  { %v1215_v48 = vpop.f32.mrf.mxu0 }
 0x1c3   :  { %v821_v49 = vpop.f32.mrf.mxu0 }
 0x1c5   :  { %v743_v50 = vpop.f32.mrf.mxu1  ;;  %v1233_v51 = vpop.f32.mrf.mxu0 }
 0x1c6   :  { %v744_v52 = vadd.f32 %v743_v50, %v657_v47 }
 0x1c7   :  { %v1224_v53 = vpop.f32.mrf.mxu1 }
 0x1c8   :  { %v822_v54 = vadd.f32 %v821_v49, %v744_v52 }
 0x1cb   :  { %v897_v55 = vpop.f32.mrf.mxu1 }
 0x1cc   :  { %v898_v56 = vadd.f32 %v897_v55, %v822_v54  ;;  %v977_v57 = vpop.f32.mrf.mxu0 }
 0x1cd   :  { %v1242_v58 = vpop.f32.mrf.mxu1 }
 0x1ce   :  { %v1251_v59 = vpop.f32.mrf.mxu0  ;;  %v978_v60 = vadd.f32 %v977_v57, %v898_v56 }
 0x1d1   :  { %v1051_v61 = vpop.f32.mrf.mxu1 }
 0x1d2   :  { %v1052_v62 = vadd.f32 %v1051_v61, %v978_v60 }
 0x1d3   :  { %v1260_v3 = vpop.f32.mrf.mxu1 }
 0x1d4   :  { %v1055_v63 = vmax.f32 %v1052_v62, 1e-10 }
 0x1d6   :  { %1264 = vlog2.f32 %v1055_v63 }
 0x1e3   :  { %v1265_v0 = vpop.eup %1264 }
 0x1e4   :  { %v1057_v1 = vmul.f32 0.6931472, %v1265_v0 }
 0x1e6   :  { %v1058_v2 = vmul.f32 4.3429446, %v1057_v1 }
 0x1e8   :  { %v1059_v4 = vadd.f32 -0.5, %v1058_v2 }
 0x1ea   :  { %1060 = vst [vmem:[#allocation2] sm:$0xff] %v1059_v4 }
 0x1eb   :  { %1277 = shalt.err (!%p1274_p4)
}
 0x1ec   :  { %1070 = dma.vmem_to_hbm [thread:$0]  %s1068_s22, 128, %s1454_s3, [#allocation3]  }
 0x1ed   :  { %1286 = dma.done.wait [#allocation3], 128  }
 0x1ee   :  { %1287 = vsyncadd [#allocation3], 4294967168 }
 0x1ef   :  { %1074 = vsyncpa [#allocation3], 1 }

</bundles_post_ra>
